<compile_context>
chip_gen: v7x
topology: tpu7x:2x2x1
jax: 0.10.0
libtpu: 0.0.40
codegen_flags: <defaults>
</compile_context>

<pallas_src>
import jax
import jax.numpy as jnp
from jax.experimental import pallas as pl
from jax.experimental.pallas import tpu as pltpu


# ----------------------------- model dimensions ------------------------------
B = 2        # batch
D = 32       # model / channel width (Conv1d channels)
L = 8        # sequence length
C = 4        # number of classes
BL = B * L


# ------------------------------- fused kernel ---------------------------------
def hyena_fused_kernel(x_ref, wqkv_ref, bqkv_ref, wf_ref, wo_ref, bo_ref,
                       wc_ref, bc_ref, out_ref):
    """One VMEM-resident kernel for the whole synthetic Hyena block.

    x_ref     : (B*L, D)     tokens, channels-last
    wqkv_ref  : (D, 3D)      merged q|k|v projection
    bqkv_ref  : (1, 3D)
    wf_ref    : (L, L, D)    Wf[t,s,d] = h[t-s,d] * 1[t>=s]  (causal depthwise filter)
    wo_ref    : (D, D), bo_ref: (1, D)
    wc_ref    : (D, C), bc_ref: (1, C)
    out_ref   : (B, C)       logits (only HBM writeback of the kernel)
    """
    x = x_ref[...]                                                    # (BL, D)

    # merged q/k/v projection: one MXU push with N = 3*D
    qkv = jnp.dot(x, wqkv_ref[...],
                  preferred_element_type=jnp.float32) + bqkv_ref[...]  # (BL, 3D)
    q = qkv[:, :D]
    k = qkv[:, D:2 * D]
    v = qkv[:, 2 * D:3 * D]
    kv = k * v                                                        # (BL, D)

    # Causal depthwise long convolution:
    #   y[b,t,d] = sum_{s<=t} h[t-s,d] * kv[b,s,d]
    # expressed as a per-channel weighted Toeplitz applied with a broadcast
    # multiply + sublane reduction (VPU/XLU only; no 256x256 MXU operand).
    kv3 = kv.reshape(B, L, D)                                         # (B, L, D)
    prod = wf_ref[...][None, :, :, :] * kv3[:, None, :, :]            # (B, L, L, D)
    y3 = jnp.sum(prod, axis=2)                                        # (B, L, D)
    y = q * y3.reshape(BL, D)                                         # output gate

    # output projection -> mean pool over time -> classifier head
    o = jnp.dot(y, wo_ref[...], preferred_element_type=jnp.float32) + bo_ref[...]
    pooled = jnp.mean(o.reshape(B, L, D), axis=1)                     # (B, D)
    out_ref[...] = jnp.dot(pooled, wc_ref[...],
                           preferred_element_type=jnp.float32) + bc_ref[...]


def _vmem():
    # Everything (inputs + weights + intermediates) is well under 1 MiB -> keep the
    # whole working set resident in VMEM; no grid, no intermediate HBM round-trips.
    return pl.BlockSpec(memory_space=pltpu.MemorySpace.VMEM)


# --------------------------------- wrappers -----------------------------------
def pretrained_hyena_forward(x_ncl, p):
    """Synthetic 'pretrained_model': Hyena returns a 3-tuple (logits, feats, gated).
    WrapperModel discards elements 2 and 3, so they are not materialized / written
    back to HBM (per performance review)."""
    x2d = jnp.transpose(x_ncl, (0, 2, 1)).reshape(BL, D)      # NCL -> (B*L, D)
    logits = pl.pallas_call(
        hyena_fused_kernel,
        out_shape=jax.ShapeDtypeStruct((B, C), jnp.float32),
        in_specs=[_vmem()] * 8,
        out_specs=_vmem(),
    )(x2d, p["Wqkv"], p["bqkv"], p["Wfilt"], p["Wo"], p["bo"], p["Wc"], p["bc"])
    return logits, None, None


def wrapper_model_forward(x_ncl, params):
    """WrapperModel.forward: output1, _, _ = pretrained_model(x); return output1."""
    output1, _, _ = pretrained_hyena_forward(x_ncl, params)
    return output1


# ------------------------- deterministic parameter init -----------------------
def make_params(key):
    ks = jax.random.split(key, 12)
    scale = 0.2
    Wq = scale * jax.random.normal(ks[0], (D, D), jnp.float32)
    Wk = scale * jax.random.normal(ks[1], (D, D), jnp.float32)
    Wv = scale * jax.random.normal(ks[2], (D, D), jnp.float32)
    bq = scale * jax.random.normal(ks[3], (1, D), jnp.float32)
    bk = scale * jax.random.normal(ks[4], (1, D), jnp.float32)
    bv = scale * jax.random.normal(ks[5], (1, D), jnp.float32)
    Wo = scale * jax.random.normal(ks[6], (D, D), jnp.float32)
    bo = scale * jax.random.normal(ks[7], (1, D), jnp.float32)
    Wc = scale * jax.random.normal(ks[8], (D, C), jnp.float32)
    bc = scale * jax.random.normal(ks[9], (1, C), jnp.float32)

    # merged q|k|v projection (one MXU push in the kernel)
    Wqkv = jnp.concatenate([Wq, Wk, Wv], axis=1)              # (D, 3D)
    bqkv = jnp.concatenate([bq, bk, bv], axis=1)              # (1, 3D)

    # Implicit long-conv filter h[lag, d] with exponential time decay (deterministic).
    h = (0.5 * jax.random.normal(ks[10], (L, D), jnp.float32)
         * jnp.exp(-0.3 * jnp.arange(L, dtype=jnp.float32))[:, None])

    # Per-channel causal Toeplitz weights: Wfilt[t, s, d] = h[t-s, d] * 1[t >= s]
    t_idx = jnp.arange(L)[:, None]
    s_idx = jnp.arange(L)[None, :]
    lag = t_idx - s_idx                                        # (t, s)
    Wfilt = jnp.where(lag[:, :, None] >= 0,
                      h[jnp.clip(lag, 0, L - 1)], 0.0)         # (L, L, D)

    return dict(Wqkv=Wqkv, bqkv=bqkv, Wo=Wo, bo=bo, Wc=Wc, bc=bc,
                Wfilt=Wfilt, h=h)


# ------------------------------ pure-JAX reference -----------------------------
def reference_forward(x_ncl, p):
    x2d = jnp.transpose(x_ncl, (0, 2, 1)).reshape(BL, D)
    qkv = x2d @ p["Wqkv"] + p["bqkv"]
    q = qkv[:, :D]
    k = qkv[:, D:2 * D]
    v = qkv[:, 2 * D:]
    kv = (k * v).reshape(B, L, D)
    q3 = q.reshape(B, L, D)
    # causal depthwise long conv (explicit loop)
    h = p["h"]
    y = jnp.zeros((B, L, D), jnp.float32)
    for t in range(L):
        acc = jnp.zeros((B, D), jnp.float32)
        for s in range(t + 1):
            acc = acc + h[t - s][None, :] * kv[:, s, :]
        y = y.at[:, t, :].set(acc)
    y = q3 * y
    o = y.reshape(BL, D) @ p["Wo"] + p["bo"]
    pooled = o.reshape(B, L, D).mean(axis=1)
    return pooled @ p["Wc"] + p["bc"]


# ------------------------------------ main -------------------------------------
if __name__ == "__main__":
    key = jax.random.PRNGKey(0)
    k_param, k_x = jax.random.split(key)
    params = make_params(k_param)

    # PyTorch Conv1d-style NCL input: (batch, channels, length)
    x = jax.random.normal(k_x, (B, D, L), jnp.float32)

    out = jax.block_until_ready(wrapper_model_forward(x, params))
    ref = reference_forward(x, params)

    assert out.shape == (B, C), f"bad output shape {out.shape}"
    assert jnp.allclose(out, ref, atol=2e-3, rtol=2e-3), (
        f"mismatch vs. reference: max abs err {jnp.max(jnp.abs(out - ref))}")

    print("KERNEL_OK")
</pallas_src>

<mosaic_0001>
module attributes {stable_mosaic.version = 11 : i64} {
  func.func @hyena_fused_kernel(%arg0: memref<16x32xf32, #tpu.memory_space<vmem>>, %arg1: memref<32x96xf32, #tpu.memory_space<vmem>>, %arg2: memref<1x96xf32, #tpu.memory_space<vmem>>, %arg3: memref<8x8x32xf32, #tpu.memory_space<vmem>>, %arg4: memref<32x32xf32, #tpu.memory_space<vmem>>, %arg5: memref<1x32xf32, #tpu.memory_space<vmem>>, %arg6: memref<32x4xf32, #tpu.memory_space<vmem>>, %arg7: memref<1x4xf32, #tpu.memory_space<vmem>>, %arg8: memref<2x4xf32, #tpu.memory_space<vmem>>) attributes {dimension_semantics = [], scalar_prefetch = 0 : i64, scratch_operands = 0 : i64, tpu.core_type = #tpu.core_type<tc>} {
    %c0 = arith.constant 0 : index
    %c0_0 = arith.constant 0 : index
    %0 = vector.load %arg0[%c0, %c0_0] : memref<16x32xf32, #tpu.memory_space<vmem>>, vector<16x32xf32>
    %c0_1 = arith.constant 0 : index
    %c0_2 = arith.constant 0 : index
    %1 = vector.load %arg1[%c0_1, %c0_2] : memref<32x96xf32, #tpu.memory_space<vmem>>, vector<32x96xf32>
    %cst = arith.constant dense<0.000000e+00> : vector<16x96xf32>
    %2 = tpu.matmul %0, %1, %cst {dimension_numbers = #tpu.dot_dimension_numbers<[1], [0], [0], [1], [0, 0, 1, 1], [], []>} : vector<16x32xf32>, vector<32x96xf32>, vector<16x96xf32> -> vector<16x96xf32>
    %c0_3 = arith.constant 0 : index
    %c0_4 = arith.constant 0 : index
    %3 = vector.load %arg2[%c0_3, %c0_4] : memref<1x96xf32, #tpu.memory_space<vmem>>, vector<1x96xf32>
    %4 = vector.broadcast %3 : vector<1x96xf32> to vector<16x96xf32>
    %5 = arith.addf %2, %4 : vector<16x96xf32>
    %6 = vector.extract_strided_slice %5 {offsets = [0, 0], sizes = [16, 32], strides = [1, 1]} : vector<16x96xf32> to vector<16x32xf32>
    %7 = vector.extract_strided_slice %5 {offsets = [0, 32], sizes = [16, 32], strides = [1, 1]} : vector<16x96xf32> to vector<16x32xf32>
    %8 = vector.extract_strided_slice %5 {offsets = [0, 64], sizes = [16, 32], strides = [1, 1]} : vector<16x96xf32> to vector<16x32xf32>
    %9 = arith.mulf %7, %8 : vector<16x32xf32>
    %10 = vector.shape_cast %9 : vector<16x32xf32> to vector<2x8x32xf32>
    %c0_5 = arith.constant 0 : index
    %c0_6 = arith.constant 0 : index
    %c0_7 = arith.constant 0 : index
    %11 = vector.load %arg3[%c0_5, %c0_6, %c0_7] : memref<8x8x32xf32, #tpu.memory_space<vmem>>, vector<8x8x32xf32>
    %12 = vector.shape_cast %11 : vector<8x8x32xf32> to vector<1x8x8x32xf32>
    %13 = vector.shape_cast %10 : vector<2x8x32xf32> to vector<2x1x8x32xf32>
    %14 = vector.broadcast %12 : vector<1x8x8x32xf32> to vector<2x8x8x32xf32>
    %15 = vector.broadcast %13 : vector<2x1x8x32xf32> to vector<2x8x8x32xf32>
    %16 = arith.mulf %14, %15 : vector<2x8x8x32xf32>
    %cst_8 = arith.constant dense<0.000000e+00> : vector<2x8x32xf32>
    %17 = vector.multi_reduction <add>, %16, %cst_8 [2] : vector<2x8x8x32xf32> to vector<2x8x32xf32>
    %18 = vector.shape_cast %17 : vector<2x8x32xf32> to vector<16x32xf32>
    %19 = arith.mulf %6, %18 : vector<16x32xf32>
    %c0_9 = arith.constant 0 : index
    %c0_10 = arith.constant 0 : index
    %20 = vector.load %arg4[%c0_9, %c0_10] : memref<32x32xf32, #tpu.memory_space<vmem>>, vector<32x32xf32>
    %cst_11 = arith.constant dense<0.000000e+00> : vector<16x32xf32>
    %21 = tpu.matmul %19, %20, %cst_11 {dimension_numbers = #tpu.dot_dimension_numbers<[1], [0], [0], [1], [0, 0, 1, 1], [], []>} : vector<16x32xf32>, vector<32x32xf32>, vector<16x32xf32> -> vector<16x32xf32>
    %c0_12 = arith.constant 0 : index
    %c0_13 = arith.constant 0 : index
    %22 = vector.load %arg5[%c0_12, %c0_13] : memref<1x32xf32, #tpu.memory_space<vmem>>, vector<1x32xf32>
    %23 = vector.broadcast %22 : vector<1x32xf32> to vector<16x32xf32>
    %24 = arith.addf %21, %23 : vector<16x32xf32>
    %25 = vector.shape_cast %24 : vector<16x32xf32> to vector<2x8x32xf32>
    %cst_14 = arith.constant dense<0.000000e+00> : vector<2x32xf32>
    %26 = vector.multi_reduction <add>, %25, %cst_14 [1] : vector<2x8x32xf32> to vector<2x32xf32>
    %cst_15 = arith.constant 8.000000e+00 : f32
    %27 = vector.broadcast %cst_15 : f32 to vector<2x32xf32>
    %28 = arith.divf %26, %27 : vector<2x32xf32>
    %c0_16 = arith.constant 0 : index
    %c0_17 = arith.constant 0 : index
    %29 = vector.load %arg6[%c0_16, %c0_17] : memref<32x4xf32, #tpu.memory_space<vmem>>, vector<32x4xf32>
    %cst_18 = arith.constant dense<0.000000e+00> : vector<2x4xf32>
    %30 = tpu.matmul %28, %29, %cst_18 {dimension_numbers = #tpu.dot_dimension_numbers<[1], [0], [0], [1], [0, 0, 1, 1], [], []>} : vector<2x32xf32>, vector<32x4xf32>, vector<2x4xf32> -> vector<2x4xf32>
    %c0_19 = arith.constant 0 : index
    %c0_20 = arith.constant 0 : index
    %31 = vector.load %arg7[%c0_19, %c0_20] : memref<1x4xf32, #tpu.memory_space<vmem>>, vector<1x4xf32>
    %32 = vector.broadcast %31 : vector<1x4xf32> to vector<2x4xf32>
    %33 = arith.addf %30, %32 : vector<2x4xf32>
    %c0_21 = arith.constant 0 : index
    %c0_22 = arith.constant 0 : index
    %34 = vector.load %arg8[%c0_21, %c0_22] : memref<2x4xf32, #tpu.memory_space<vmem>>, vector<2x4xf32>
    tpu.vector_store %arg8[%c0_21, %c0_22], %33 {strides = array<i32>} : memref<2x4xf32, #tpu.memory_space<vmem>>, vector<2x4xf32>,
    return
  }
}

</mosaic_0001>

<bundles_post_ra>
// kernel: tpu_custom_call.1
= control target key start
LH: loop header
LB: loop body
LE: loop exit
PB: predicated region body
PF: predicated region fallthrough
CT: control target
= control target key end

     0   :  { %13 = vsyncpa [#allocation3], 0  ;;  %s971_s0 = inlined_call_operand.hbm [shape: f32[16,32], index: 0, kind: input, shape index: {}]   ;;  %s972_s1 = inlined_call_operand.vmem [shape: f32[32,96], index: 1, kind: input, shape index: {}]   ;;  %s973_s2 = inlined_call_operand.vmem [shape: f32[1,96], index: 2, kind: input, shape index: {}]   ;;  %s974_s3 = inlined_call_operand.hbm [shape: f32[8,8,32], index: 3, kind: input, shape index: {}]   ;;  %s975_s4 = inlined_call_operand.hbm [shape: f32[32,32], index: 4, kind: input, shape index: {}]   ;;  %s976_s5 = inlined_call_operand.vmem [shape: f32[1,32], index: 5, kind: input, shape index: {}]   ;;  %s977_s6 = inlined_call_operand.vmem [shape: f32[32,4], index: 6, kind: input, shape index: {}]   ;;  %s978_s7 = inlined_call_operand.vmem [shape: f32[1,4], index: 7, kind: input, shape index: {}]   ;;  %s979_s8 = inlined_call_operand.hbm [shape: f32[2,4], index: 8, kind: output, shape index: {}]  }
   0x1   :  { %14 = vsyncpa [#allocation6], 0 }
   0x2   :  { %15 = vsyncpa [#allocation4], 0  ;;  %s758_s27 = smov [#allocation5]   ;;  %s759_s29 = smov [#allocation2]  }
   0x3   :  { %s37_s28 = sshll.u32 %s758_s27, 4  ;;  %s21_s30 = sshll.u32 %s759_s29, 4  ;;  %s38_s28 = int_to_ptr.vmem [resolvable:$true] %s37_s28  ;;  %s813_s30 = int_to_ptr.vmem [resolvable:$true] %s21_s30 }
   0x4   :  { %s664_s11 = scalar_lea.hbm %s974_s3, 1024 }
   0x5   :  { %p665_p0 = scmp.ne.s32.totalorder %s974_s3, %s664_s11  ;;  %p668_p1 = scmp.lt.u32.totalorder %s664_s11, %s974_s3 }
   0x7   :  { %p670_p2 = pnand %p668_p1, %p665_p0 }
   0x9   :  { %673 = shalt.err (!%p670_p2)
}
   0xa   :  { %s674_s16 = scalar_lea.vmem %s38_s28, 1024  ;;  %p679_p4 = scmp.lt.s32.totalorder %s38_s28, %s38_s28 }
   0xb   :  { %p675_p3 = scmp.ne.s32.totalorder %s38_s28, %s674_s16  ;;  %p680_p5 = scmp.lt.s32.totalorder %s674_s16, %s674_s16 }
   0xd   :  { %p681_p6 = por %p680_p5, %p679_p4 }
   0xf   :  { %p682_p7 = pnand %p681_p6, %p675_p3 }
  0x11   :  { %685 = shalt.err (!%p682_p7)
}
  0x12   :  { %s760_s17 = smov 128   ;;  %s761_s18 = smov 8  }
  0x13   :  { %43 = dma.hbm_to_vmem [thread:$0]  %s974_s3, 1024, %s38_s28, [#allocation6], %s760_s17, %s760_s17, %s761_s18  }
  0x14   :  { %s686_s23 = scalar_lea.hbm %s971_s0, 256 }
  0x15   :  { %p687_p8 = scmp.ne.s32.totalorder %s971_s0, %s686_s23  ;;  %p690_p9 = scmp.lt.u32.totalorder %s686_s23, %s971_s0 }
  0x17   :  { %p692_p10 = pnand %p690_p9, %p687_p8 }
  0x19   :  { %695 = shalt.err (!%p692_p10)
}
  0x1a   :  { %s696_s29 = scalar_lea.vmem %s813_s30, 256  ;;  %p701_p12 = scmp.lt.s32.totalorder %s813_s30, %s813_s30 }
  0x1b   :  { %p697_p11 = scmp.ne.s32.totalorder %s813_s30, %s696_s29  ;;  %p702_p13 = scmp.lt.s32.totalorder %s696_s29, %s696_s29 }
  0x1d   :  { %p703_p0 = por %p702_p13, %p701_p12 }
  0x1f   :  { %p704_p1 = pnand %p703_p0, %p697_p11 }
  0x21   :  { %707 = shalt.err (!%p704_p1)
}
  0x22   :  { %27 = dma.hbm_to_vmem [thread:$0]  %s971_s0, 256, %s813_s30, [#allocation3], %s760_s17, %s760_s17, %s761_s18  }
  0x23   :  { %s762_s9 = smov [#allocation7]   ;;  %s708_s13 = scalar_lea.hbm %s975_s4, 512 }
  0x24   :  { %s49_s10 = sshll.u32 %s762_s9, 4  ;;  %p709_p2 = scmp.ne.s32.totalorder %s975_s4, %s708_s13  ;;  %s50_s10 = int_to_ptr.vmem [resolvable:$true] %s49_s10 }
  0x25   :  { %p712_p3 = scmp.lt.u32.totalorder %s708_s13, %s975_s4 }
  0x27   :  { %p714_p4 = pnand %p712_p3, %p709_p2 }
  0x29   :  { %717 = shalt.err (!%p714_p4)
}
  0x2a   :  { %s718_s20 = scalar_lea.vmem %s50_s10, 512  ;;  %p723_p6 = scmp.lt.s32.totalorder %s50_s10, %s50_s10 }
  0x2b   :  { %p719_p5 = scmp.ne.s32.totalorder %s50_s10, %s718_s20  ;;  %p724_p7 = scmp.lt.s32.totalorder %s718_s20, %s718_s20 }
  0x2d   :  { %p725_p8 = por %p724_p7, %p723_p6 }
  0x2f   :  { %p726_p9 = pnand %p725_p8, %p719_p5 }
  0x31   :  { %729 = shalt.err (!%p726_p9)
}
  0x32   :  { %55 = dma.hbm_to_vmem [thread:$0]  %s975_s4, 512, %s50_s10, [#allocation6], %s760_s17, %s760_s17, %s761_s18  }
  0x33   :  { %752 = dma.done.wait [#allocation3], 256  }
  0x34   :  { %753 = vsyncadd [#allocation3], 4294967040 }
  0x35   :  { %754 = dma.done.wait [#allocation6], 1536  }
  0x36   :  { %755 = vsyncadd [#allocation6], 4294965760  ;;  %vm84_vm0 = vcmask 261120   ;;  %v73_v0 = vld [vmem:[%s972_s1] sm:$0xff]  ;;  %v74_v1 = vld [vmem:[%s972_s1 + $0x8] sm:$0xff]  ;;  %vm336_vm1 = vcmask 1041409  }
  0x37   :  { %v75_v2 = vld [vmem:[%s972_s1 + $0x10] sm:$0xff]  ;;  %v632_v3 = vpack.c.bf16 %v74_v1, %v73_v0  ;;  %v76_v4 = vld [vmem:[%s972_s1 + $0x18] sm:$0xff]  ;;  %v71_v5 = vld [vmem:[#allocation2] sm:$0xff]  ;;  %s763_s1 = smov 96   ;;  %vm338_vm2 = vcmask 1042434   ;;  %vm340_vm3 = vcmask 1043459  }
  0x38   :  { %v636_v6 = vpack.c.bf16 %v76_v4, %v75_v2  ;;  %607 = vmatprep.mubr.msk.f32.mxu0 %vm84_vm0, %v71_v5  ;;  %v72_v7 = vld [vmem:[#allocation2 + $0x8] sm:$0xff]  ;;  %v574_v8 = vld [vmem:[%s973_s2] ss:$0 sm:$0xff]  ;;  %v361_v17 = vld [vmem:[#allocation7] sm:$0xff]  ;;  %vm342_vm4 = vcmask 1044484   ;;  %vm344_vm5 = vcmask 1045509  }
  0x39   :  { %633 = vmatprep.subr.bf16.mxu0 %v632_v3  ;;  %v362_v18 = vld [vmem:[#allocation7 + $0x8] sm:$0xff]  ;;  %v363_v19 = vld [vmem:[#allocation7 + $0x10] sm:$0xff]  ;;  %v364_v21 = vld [vmem:[#allocation7 + $0x18] sm:$0xff]  ;;  %vm346_vm6 = vcmask 1046534   ;;  %vm348_vm7 = vcmask 1047559   ;;  %vm765_vm8 = vmmov 0  }
  0x3a   :  { %635 = vmatpush3.bf16.msra.mxu0 %v632_v3  ;;  %v640_v20 = vpack.c.bf16 %v362_v18, %v361_v17  ;;  %v644_v22 = vpack.c.bf16 %v364_v21, %v363_v19  ;;  %v176_v23 = vld [vmem:[#allocation5] sm:$0xff]  ;;  %v177_v24 = vld [vmem:[#allocation5 + $0x8] sm:$0xff]  ;;  %v178_v25 = vld [vmem:[#allocation5 + $0x10] sm:$0xff]  ;;  %s767_s15 = smov [#allocation8]   ;;  %vm556_vm9 = vcmask 25600  }
  0x3b   :  { %637 = vmatprep.subr.bf16.mxu0 %v636_v6  ;;  %v179_v26 = vld [vmem:[#allocation5 + $0x18] sm:$0xff]  ;;  %v180_v28 = vld [vmem:[#allocation5 + $0x20] sm:$0xff]  ;;  %v181_v29 = vld [vmem:[#allocation5 + $0x28] sm:$0xff]  ;;  %s564_s16 = sshll.u32 %s767_s15, 4  ;;  %s565_s16 = int_to_ptr.vmem [resolvable:$true] %s564_s16 }
  0x3c   :  { %641 = vmatprep.subr.bf16.mxu1 %v640_v20  ;;  %v182_v50 = vld [vmem:[#allocation5 + $0x30] sm:$0xff]  ;;  %s730_s19 = scalar_lea.vmem %s565_s16, 32  ;;  %p735_p11 = scmp.lt.s32.totalorder %s565_s16, %s565_s16 }
  0x3d   :  { %643 = vmatpush3.bf16.msra.mxu1 %v640_v20  ;;  %p731_p10 = scmp.ne.s32.totalorder %s565_s16, %s730_s19  ;;  %p736_p12 = scmp.lt.s32.totalorder %s730_s19, %s730_s19 }
  0x3e   :  { %639 = vmatpush3.bf16.msra.mxu0 %v636_v6  ;;  %645 = vmatprep.subr.bf16.mxu1 %v644_v22 }
  0x3f   :  { %p737_p13 = por %p736_p12, %p735_p11 }
  0x41   :  { %608 = vmatmul.mubr.msk.f32.vlgmr.msra.gmra.mrb[0].mxu0 %vm84_vm0, %v72_v7  ;;  %647 = vmatpush3.bf16.msra.mxu1 %v644_v22  ;;  %p738_p0 = pnand %p737_p13, %p731_p10 }
 0x114   :  { %v609_v9 = vpop.f32.mrb[0].mxu0 }
 0x115   :  { %v157_v10 = vpop.f32.mrb[1].mxu0  ;;  %v885_v12 = vadd.f32 %v609_v9, %v574_v8 }
 0x116   :  { %v882_v11 = vadd.f32 %v574_v8, %v157_v10 }
 0x118   :  { %168 = vrot.lane.b32.xlu0 %v882_v11, %s763_s1 }
 0x11c   :  { %170 = vrot.lane.b32.xlu0 %v885_v12, %s763_s1 }
 0x18a   :  { %v169_v13 = vpop.permute.xlu0 %168 }
 0x18b   :  { %v174_v14 = vmul.f32 %v169_v13, %v882_v11 }
 0x18d   :  { %186 = vrot.lane.b32.xlu1 %v174_v14, %s763_s1 }
 0x18e   :  { %v171_v15 = vpop.permute.xlu0 %170 }
 0x18f   :  { %v175_v16 = vmul.f32 %v171_v15, %v885_v12 }
 0x191   :  { %188 = vrot.lane.b32.xlu1 %v175_v16, %s763_s1  ;;  %v183_v16 = vld [vmem:[#allocation5 + $0x38] sm:$0xff] }
 0x1ff   :  { %v890_v27 = vpop.permute.xlu1 %186 }
 0x200   :  { %v192_v30 = vmul.f32 %v890_v27, %v176_v23  ;;  %v193_v31 = vmul.f32 %v890_v27, %v177_v24  ;;  %v194_v32 = vmul.f32 %v890_v27, %v178_v25  ;;  %v195_v33 = vmul.f32 %v890_v27, %v179_v26 }
 0x201   :  { %v196_v37 = vmul.f32 %v890_v27, %v180_v28  ;;  %v901_v38 = vmul.f32 %v890_v27, %v181_v29  ;;  %v198_v22 = vmul.f32 %v890_v27, %v182_v50 }
 0x202   :  { %v208_v34 = vsel %vm84_vm0, %v192_v30, 0.0  ;;  %v215_v35 = vsel %vm84_vm0, %v193_v31, 0.0  ;;  %v222_v36 = vsel %vm84_vm0, %v194_v32, 0.0  ;;  %v229_v48 = vsel %vm84_vm0, %v195_v33, 0.0 }
 0x203   :  { %v209_v39 = vrot.slane %v208_v34, 4  ;;  %v216_v40 = vrot.slane %v215_v35, 4  ;;  %v189_v41 = vpop.permute.xlu1 %188  ;;  %v223_v47 = vrot.slane %v222_v36, 4  ;;  %v230_v13 = vrot.slane %v229_v48, 4 }
 0x204   :  { %v200_v42 = vmul.f32 %v189_v41, %v176_v23  ;;  %v201_v43 = vmul.f32 %v189_v41, %v177_v24  ;;  %v202_v44 = vmul.f32 %v189_v41, %v178_v25  ;;  %v203_v45 = vmul.f32 %v189_v41, %v179_v26 }
 0x205   :  { %v210_v46 = vadd.f32 %v209_v39, %v208_v34  ;;  %v204_v49 = vmul.f32 %v189_v41, %v180_v28  ;;  %v217_v51 = vadd.f32 %v216_v40, %v215_v35  ;;  %v205_v52 = vmul.f32 %v189_v41, %v181_v29 }
 0x206   :  { %v264_v53 = vsel %vm84_vm0, %v200_v42, 0.0  ;;  %v271_v54 = vsel %vm84_vm0, %v201_v43, 0.0  ;;  %v206_v56 = vmul.f32 %v189_v41, %v182_v50  ;;  %v278_v59 = vsel %vm84_vm0, %v202_v44, 0.0 }
 0x207   :  { %v211_v55 = vrot.slane %v210_v46, 2  ;;  %v265_v57 = vrot.slane %v264_v53, 4  ;;  %v272_v58 = vrot.slane %v271_v54, 4  ;;  %v285_v60 = vsel %vm84_vm0, %v203_v45, 0.0 }
 0x208   :  { %v292_v61 = vsel %vm84_vm0, %v204_v49, 0.0  ;;  %v299_v62 = vsel %vm84_vm0, %v205_v52, 0.0  ;;  %v279_v1 = vrot.slane %v278_v59, 4  ;;  %v286_v2 = vrot.slane %v285_v60, 4 }
 0x209   :  { %v266_v63 = vadd.f32 %v265_v57, %v264_v53  ;;  %v273_v0 = vadd.f32 %v272_v58, %v271_v54  ;;  %v218_v3 = vrot.slane %v217_v51, 2  ;;  %v224_v4 = vadd.f32 %v223_v47, %v222_v36 }
 0x20a   :  { %v293_v5 = vrot.slane %v292_v61, 4  ;;  %v300_v6 = vrot.slane %v299_v62, 4  ;;  %v280_v9 = vadd.f32 %v279_v1, %v278_v59  ;;  %v287_v10 = vadd.f32 %v286_v2, %v285_v60 }
 0x20b   :  { %v267_v7 = vrot.slane %v266_v63, 2  ;;  %v274_v8 = vrot.slane %v273_v0, 2  ;;  %v306_v15 = vsel %vm84_vm0, %v206_v56, 0.0  ;;  %v212_v17 = vadd.f32 %v211_v55, %v210_v46 }
 0x20c   :  { %v294_v14 = vadd.f32 %v293_v5, %v292_v61  ;;  %v281_v20 = vrot.slane %v280_v9, 2  ;;  %v288_v21 = vrot.slane %v287_v10, 2  ;;  %v219_v24 = vadd.f32 %v218_v3, %v217_v51 }
 0x20d   :  { %v268_v18 = vadd.f32 %v267_v7, %v266_v63  ;;  %v275_v19 = vadd.f32 %v274_v8, %v273_v0  ;;  %v213_v23 = vrot.slane %v212_v17, 1  ;;  %v225_v25 = vrot.slane %v224_v4, 2 }
 0x20e   :  { %v301_v26 = vadd.f32 %v300_v6, %v299_v62  ;;  %v307_v28 = vrot.slane %v306_v15, 4  ;;  %v199_v29 = vmul.f32 %v890_v27, %v183_v16  ;;  %v207_v30 = vmul.f32 %v189_v41, %v183_v16 }
 0x20f   :  { %v269_v31 = vrot.slane %v268_v18, 1  ;;  %v276_v32 = vrot.slane %v275_v19, 1  ;;  %v226_v33 = vadd.f32 %v225_v25, %v224_v4  ;;  %v231_v34 = vadd.f32 %v230_v13, %v229_v48 }
 0x210   :  { %v282_v35 = vadd.f32 %v281_v20, %v280_v9  ;;  %v289_v36 = vadd.f32 %v288_v21, %v287_v10  ;;  %v295_v39 = vrot.slane %v294_v14, 2  ;;  %v236_v40 = vsel %vm84_vm0, %v196_v37, 0.0 }
 0x211   :  { %v214_v42 = vadd.f32 %v213_v23, %v212_v17  ;;  %v220_v43 = vrot.slane %v219_v24, 1  ;;  %v232_v44 = vrot.slane %v231_v34, 2  ;;  %v237_v45 = vrot.slane %v236_v40, 4 }
 0x212   :  { %v227_v46 = vrot.slane %v226_v33, 1  ;;  %v243_v47 = vsel %vm84_vm0, %v901_v38, 0.0  ;;  %v250_v27 = vsel %vm84_vm0, %v198_v22, 0.0  ;;  %v257_v41 = vsel %vm84_vm0, %v199_v29, 0.0 }
 0x213   :  { %v270_v48 = vadd.f32 %v269_v31, %v268_v18  ;;  %v277_v49 = vadd.f32 %v276_v32, %v275_v19  ;;  %v238_v50 = vadd.f32 %v237_v45, %v236_v40  ;;  %v244_v51 = vrot.slane %v243_v47, 4 }
 0x214   :  { %v283_v52 = vrot.slane %v282_v35, 1  ;;  %v233_v37 = vadd.f32 %v232_v44, %v231_v34  ;;  %v251_v53 = vrot.slane %v250_v27, 4  ;;  %v258_v54 = vrot.slane %v257_v41, 4 }
 0x215   :  { %v239_v55 = vrot.slane %v238_v50, 2  ;;  %v245_v56 = vadd.f32 %v244_v51, %v243_v47  ;;  %v296_v57 = vadd.f32 %v295_v39, %v294_v14  ;;  %v302_v58 = vrot.slane %v301_v26, 2 }
 0x216   :  { %v221_v38 = vadd.f32 %v220_v43, %v219_v24  ;;  %v228_v59 = vadd.f32 %v227_v46, %v226_v33  ;;  %v252_v60 = vadd.f32 %v251_v53, %v250_v27  ;;  %v259_v61 = vadd.f32 %v258_v54, %v257_v41  ;;  %v470_v54 = vld [vmem:[%s977_s6] sm:$0xff] }
 0x217   :  { %v240_v62 = vadd.f32 %v239_v55, %v238_v50  ;;  %v246_v63 = vrot.slane %v245_v56, 2  ;;  %v290_v0 = vrot.slane %v289_v36, 1  ;;  %v303_v1 = vadd.f32 %v302_v58, %v301_v26  ;;  %v471_v55 = vld [vmem:[%s977_s6 + $0x8] sm:$0xff] }
 0x218   :  { %v234_v2 = vrot.slane %v233_v37, 1  ;;  %v253_v3 = vrot.slane %v252_v60, 2  ;;  %v260_v4 = vrot.slane %v259_v61, 2  ;;  %v308_v5 = vadd.f32 %v307_v28, %v306_v15 }
 0x219   :  { %v241_v6 = vrot.slane %v240_v62, 1  ;;  %v247_v7 = vadd.f32 %v246_v63, %v245_v56  ;;  %v297_v8 = vrot.slane %v296_v57, 1  ;;  %v313_v9 = vsel %vm84_vm0, %v207_v30, 0.0 }
 0x21a   :  { %v254_v10 = vadd.f32 %v253_v3, %v252_v60  ;;  %v261_v13 = vadd.f32 %v260_v4, %v259_v61  ;;  %v309_v14 = vrot.slane %v308_v5, 2  ;;  %v314_v16 = vrot.slane %v313_v9, 4 }
 0x21b   :  { %v284_v17 = vadd.f32 %v283_v52, %v282_v35  ;;  %v248_v18 = vrot.slane %v247_v7, 1  ;;  %v304_v19 = vrot.slane %v303_v1, 1  ;;  %v337_v20 = vsel %vm336_vm1, %v221_v38, %v214_v42 }
 0x21c   :  { %v255_v21 = vrot.slane %v254_v10, 1  ;;  %v291_v22 = vadd.f32 %v290_v0, %v289_v36  ;;  %v310_v23 = vadd.f32 %v309_v14, %v308_v5  ;;  %v315_v24 = vadd.f32 %v314_v16, %v313_v9 }
 0x21d   :  { %v235_v15 = vadd.f32 %v234_v2, %v233_v37  ;;  %v262_v25 = vrot.slane %v261_v13, 1  ;;  %v339_v26 = vsel %vm338_vm2, %v228_v59, %v337_v20  ;;  %v350_v28 = vsel %vm336_vm1, %v277_v49, %v270_v48  ;;  %v577_v59 = vld [vmem:[%s976_s5] ss:$0 sm:$0xff] }
 0x21e   :  { %v242_v29 = vadd.f32 %v241_v6, %v240_v62  ;;  %v298_v30 = vadd.f32 %v297_v8, %v296_v57  ;;  %v311_v31 = vrot.slane %v310_v23, 1  ;;  %v316_v32 = vrot.slane %v315_v24, 2  ;;  %v473_v57 = vld [vmem:[%s977_s6 + $0x18] sm:$0xff]  ;;  %v580_v20 = vld [vmem:[%s978_s7] ss:$0 sm:$0xff] }
 0x21f   :  { %v249_v33 = vadd.f32 %v248_v18, %v247_v7  ;;  %v305_v34 = vadd.f32 %v304_v19, %v303_v1  ;;  %v341_v35 = vsel %vm340_vm3, %v235_v15, %v339_v26  ;;  %v351_v39 = vsel %vm338_vm2, %v284_v17, %v350_v28 }
 0x220   :  { %v256_v40 = vadd.f32 %v255_v21, %v254_v10  ;;  %v317_v36 = vadd.f32 %v316_v32, %v315_v24  ;;  %v343_v42 = vsel %vm342_vm4, %v242_v29, %v341_v35  ;;  %v352_v43 = vsel %vm340_vm3, %v291_v22, %v351_v39 }
 0x221   :  { %v263_v44 = vadd.f32 %v262_v25, %v261_v13  ;;  %v312_v45 = vadd.f32 %v311_v31, %v310_v23  ;;  %v345_v46 = vsel %vm344_vm5, %v249_v33, %v343_v42  ;;  %v353_v47 = vsel %vm342_vm4, %v298_v30, %v352_v43 }
 0x222   :  { %v318_v27 = vrot.slane %v317_v36, 1  ;;  %v347_v41 = vsel %vm346_vm6, %v256_v40, %v345_v46  ;;  %v354_v48 = vsel %vm344_vm5, %v305_v34, %v353_v47  ;;  %v649_v56 = vpack.c.bf16 %v471_v55, %v470_v54 }
 0x223   :  { %v349_v49 = vsel %vm348_vm7, %v263_v44, %v347_v41  ;;  %v355_v50 = vsel %vm346_vm6, %v312_v45, %v354_v48  ;;  %v766_v58 = vmov 0.0  }
 0x224   :  { %v319_v51 = vadd.f32 %v318_v27, %v317_v36  ;;  %v359_v52 = vmul.f32 %v349_v49, %v882_v11  ;;  %v472_v11 = vld [vmem:[%s977_s6 + $0x10] sm:$0xff]  ;;  %629 = vmatprep.mubr.msk.f32.mxu0 %vm765_vm8, %v766_v58 }
 0x225   :  { %v652_v38 = vpack.c.bf16 %v473_v57, %v472_v11 }
 0x226   :  { %v356_v37 = vsel %vm348_vm7, %v319_v51, %v355_v50  ;;  %618 = vmatprep.mubr.msk.f32.mxu1 %vm84_vm0, %v359_v52 }
 0x227   :  { %v360_v53 = vmul.f32 %v356_v37, %v885_v12  ;;  %v764_v12 = vmov 0.0|0.0  }
 0x228   :  { %648 = vmatprep.subr.bf16.mxu0 %v764_v12 }
 0x229   :  { %619 = vmatmul.mubr.msk.f32.vlgmr.msra.gmra.mrb[0].mxu1 %vm84_vm0, %v360_v53  ;;  %650 = vmatpush3.bf16.msra.mxu0 %v649_v56 }
 0x22a   :  { %651 = vmatprep.subr.bf16.mxu0 %v764_v12 }
 0x22d   :  { %653 = vmatpush3.bf16.msra.mxu0 %v652_v38 }
 0x2fc   :  { %v620_v60 = vpop.f32.mrb[0].mxu1 }
 0x2fd   :  { %v450_v61 = vadd.f32 %v620_v60, %v577_v59  ;;  %v444_v62 = vpop.f32.mrb[1].mxu1 }
 0x2fe   :  { %v445_v63 = vadd.f32 %v577_v59, %v444_v62 }
 0x2ff   :  { %v460_v0 = vsel %vm84_vm0, %v450_v61, 0.0 }
 0x300   :  { %v461_v1 = vrot.slane %v460_v0, 4  ;;  %v453_v2 = vsel %vm84_vm0, %v445_v63, 0.0 }
 0x301   :  { %v454_v3 = vrot.slane %v453_v2, 4 }
 0x302   :  { %v462_v4 = vadd.f32 %v461_v1, %v460_v0 }
 0x303   :  { %v455_v5 = vadd.f32 %v454_v3, %v453_v2 }
 0x304   :  { %v463_v6 = vrot.slane %v462_v4, 2 }
 0x305   :  { %v456_v7 = vrot.slane %v455_v5, 2 }
 0x306   :  { %v464_v8 = vadd.f32 %v463_v6, %v462_v4 }
 0x307   :  { %v457_v9 = vadd.f32 %v456_v7, %v455_v5 }
 0x308   :  { %v465_v10 = vrot.slane %v464_v8, 1 }
 0x309   :  { %v458_v13 = vrot.slane %v457_v9, 1 }
 0x30a   :  { %v466_v14 = vadd.f32 %v465_v10, %v464_v8 }
 0x30b   :  { %v459_v16 = vadd.f32 %v458_v13, %v457_v9 }
 0x30c   :  { %v469_v17 = vmul.f32 0.125, %v466_v14 }
 0x30d   :  { %v468_v18 = vmul.f32 0.125, %v459_v16 }
 0x30f   :  { %v483_v19 = vsel %vm336_vm1, %v469_v17, %v468_v18 }
 0x310   :  { %630 = vmatmul.mubr.msk.f32.vlgmr.msra.gmra.mrb[2].mxu0 %vm84_vm0, %v483_v19 }
 0x3e3   :  { %v552_v21 = vpop.f32.mrb[2].mxu0 }
 0x3e4   :  { %v553_v22 = vadd.f32 %v580_v20, %v552_v21  ;;  %v631_v23 = vpop.f32.mrb[3].mxu0 }
 0x3e6   :  { %557 = vst.msk [vmem:[#allocation8] sm:$0x3] %vm556_vm9, %v553_v22 }
 0x3e7   :  { %741 = shalt.err (!%p738_p0)
}
 0x3e8   :  { %s742_s30 = scalar_lea.hbm %s979_s8, 32 }
 0x3e9   :  { %p743_p1 = scmp.ne.s32.totalorder %s979_s8, %s742_s30  ;;  %p746_p2 = scmp.lt.u32.totalorder %s742_s30, %s979_s8 }
 0x3eb   :  { %p748_p3 = pnand %p746_p2, %p743_p1 }
 0x3ed   :  { %751 = shalt.err (!%p748_p3)
}
 0x3ee   :  { %567 = dma.vmem_to_hbm [thread:$0]  %s565_s16, 32, %s979_s8, [#allocation4]  }
 0x3ef   :  { %756 = dma.done.wait [#allocation4], 32  }
 0x3f0   :  { %757 = vsyncadd [#allocation4], 4294967264 }
 0x3f1   :  { %571 = vsyncpa [#allocation3], 1 }
 0x3f2   :  { %572 = vsyncpa [#allocation6], 1 }
 0x3f3   :  { %573 = vsyncpa [#allocation4], 1 }

</bundles_post_ra>
